<compile_context>
chip_gen: v7x
topology: tpu7x:2x2x1
jax: 0.10.0
libtpu: 0.0.40
codegen_flags: <defaults>
</compile_context>

<pallas_src>
import functools
import math

import jax
import jax.numpy as jnp
from jax.experimental import pallas as pl
from jax.experimental.pallas import tpu as pltpu


def _sigmoid(z):
    # sigmoid(z) == 0.5 * (1 + tanh(z / 2)) -> one native EUP tanh per gate.
    return 0.5 * (jnp.tanh(0.5 * z) + 1.0)


def lstm_cell_kernel(xh_ref, w_ref, b_ref, cx_ref, hy_ref, cy_ref, acc_ref, *, tH):
    """Blocks: xh (tB,tK), w (tK,4*tH), b (1,4*tH) f32, cx/hy/cy (tB,tH),
    acc (tB,4*tH) f32.  Gate g occupies accumulator lanes [g*tH, (g+1)*tH)."""
    k = pl.program_id(2)

    @pl.when(k == 0)
    def _init():
        # Fold the combined bias into the accumulator init (sublane broadcast).
        acc_ref[...] = jnp.broadcast_to(b_ref[...], acc_ref.shape)

    # Single fused 4-gate MXU dot, f32 accumulation.
    acc_ref[...] += jnp.dot(xh_ref[...], w_ref[...],
                            preferred_element_type=jnp.float32)

    @pl.when(k == pl.num_programs(2) - 1)
    def _finalize():
        # Read per gate; store cy early to keep the live set small.
        ft = _sigmoid(acc_ref[:, 0 * tH:1 * tH])
        it = _sigmoid(acc_ref[:, 1 * tH:2 * tH])
        gt = jnp.tanh(acc_ref[:, 2 * tH:3 * tH])
        cy = ft * cx_ref[...].astype(jnp.float32) + it * gt
        cy_ref[...] = cy.astype(cy_ref.dtype)
        ot = _sigmoid(acc_ref[:, 3 * tH:4 * tH])
        hy_ref[...] = (ot * jnp.tanh(cy)).astype(hy_ref.dtype)


def _pick_tile(dim, max_tile, align):
    """Largest tile <= max_tile that divides dim and is a multiple of `align`;
    dims that already fit use the full dim (always a legal BlockSpec block)."""
    if dim <= max_tile:
        return dim
    t = (min(max_tile, dim) // align) * align
    while t >= align:
        if dim % t == 0:
            return t
        t -= align
    # Fallback: full dim.  Legal, but can produce masked stores / large blocks
    # for awkward (non-128-divisible) sizes; pad H/K upstream in that case.
    return dim


def _fuse_params(w_x2h, b_x2h, w_h2h, b_h2h, H, tH, compute_dtype):
    """[Wx | Wh] stacked on the input dim, gates interleaved per hidden tile:
    result layout (K, n_ht*4*tH) so one weight block = one (tK, 4*tH) slab."""
    w = jnp.concatenate([w_x2h, w_h2h], axis=1)          # (4H, K) PyTorch (out,in)
    K = w.shape[1]
    n_ht = H // tH
    # (4H, K) -> (4, n_ht, tH, K) -> (K, n_ht, 4, tH) -> (K, 4H)
    w = (w.reshape(4, n_ht, tH, K)
          .transpose(3, 1, 0, 2)
          .reshape(K, n_ht * 4 * tH)
          .astype(compute_dtype))
    b = ((b_x2h + b_h2h).reshape(4, n_ht, tH)
                        .transpose(1, 0, 2)
                        .reshape(1, n_ht * 4 * tH)
                        .astype(jnp.float32))
    return w, b


def _vmem_limit_bytes(tB, tH, tK, compute_dtype, out_dtype, cx_dtype):
    cb = jnp.dtype(compute_dtype).itemsize
    ob = jnp.dtype(out_dtype).itemsize
    xb = jnp.dtype(cx_dtype).itemsize
    used = (2 * tB * tK * cb            # xh, double-buffered
            + 2 * tK * 4 * tH * cb      # w
            + 2 * 4 * tH * 4            # bias (f32)
            + 2 * tB * tH * xb          # cx
            + 2 * 2 * tB * tH * ob      # hy, cy
            + tB * 4 * tH * 4)          # f32 accumulator
    # 1.5x headroom + 4 MiB for internal scratch; never below the 32 MiB default.
    return max(32 << 20, min(100 << 20, int(used * 1.5) + (4 << 20)))


def lstm_cell(x, hx, cx, w_x2h, b_x2h, w_h2h, b_h2h, *,
              compute_dtype=None, tb_max=256, th_max=512, tk_max=None):
    """x (B,I), hx/cx (B,H); weights in PyTorch Linear layout (4H,I)/(4H,H),
    biases (4H,).  Returns (hy, cy), each (B,H) in x.dtype."""
    B, I = x.shape
    if hx is None:                      # match the module's hx=None path
        hx = jnp.zeros((B, w_h2h.shape[1]), x.dtype)
        cx = jnp.zeros_like(hx)
    H = hx.shape[-1]
    K = I + H
    out_dtype = x.dtype
    compute_dtype = compute_dtype or x.dtype
    if tk_max is None:
        tk_max = 2048 if jnp.dtype(compute_dtype).itemsize <= 2 else 1024

    sub_align = 16 if jnp.dtype(compute_dtype).itemsize <= 2 else 8
    tB = _pick_tile(B, tb_max, sub_align)
    tH = _pick_tile(H, th_max, 128)
    tK = _pick_tile(K, tk_max, 128)

    # v7x has 2 TensorCores: make sure the "parallel" axes give >= 2 blocks
    # when the shapes allow it (no-op on v5e/v6e).
    if (B // tB) * (H // tH) < 2:
        if tH % 256 == 0:
            tH //= 2
        elif tB % (2 * sub_align) == 0:
            tB //= 2

    grid = (B // tB, H // tH, K // tK)

    # Fuse the two matmuls and interleave the 4 gates per hidden tile.
    # TODO(synk): for big B / sequence loops, skip this concat (write x/hx into
    # a preallocated fused buffer or split the K grid into I- and H-segments).
    xh = jnp.concatenate([x, hx], axis=1).astype(compute_dtype)   # (B, K)
    w, b = _fuse_params(w_x2h, b_x2h, w_h2h, b_h2h, H, tH, compute_dtype)

    kernel = functools.partial(lstm_cell_kernel, tH=tH)
    hy, cy = pl.pallas_call(
        kernel,
        out_shape=(jax.ShapeDtypeStruct((B, H), out_dtype),
                   jax.ShapeDtypeStruct((B, H), out_dtype)),
        grid_spec=pltpu.PrefetchScalarGridSpec(
            num_scalar_prefetch=0,
            grid=grid,
            in_specs=[
                pl.BlockSpec((tB, tK), lambda bi, hi, ki: (bi, ki)),       # xh
                pl.BlockSpec((tK, 4 * tH), lambda bi, hi, ki: (ki, hi)),   # w (gate-interleaved)
                pl.BlockSpec((1, 4 * tH), lambda bi, hi, ki: (0, hi)),     # combined bias
                pl.BlockSpec((tB, tH), lambda bi, hi, ki: (bi, hi)),       # cx
            ],
            out_specs=[
                pl.BlockSpec((tB, tH), lambda bi, hi, ki: (bi, hi)),       # hy
                pl.BlockSpec((tB, tH), lambda bi, hi, ki: (bi, hi)),       # cy
            ],
            scratch_shapes=[pltpu.VMEM((tB, 4 * tH), jnp.float32)],        # f32 accumulator
        ),
        compiler_params=pltpu.CompilerParams(
            dimension_semantics=("parallel", "parallel", "arbitrary"),
            vmem_limit_bytes=_vmem_limit_bytes(tB, tH, tK, compute_dtype,
                                               out_dtype, cx.dtype),
        ),
    )(xh, w, b, cx)
    return hy, cy


def make_params(key, input_size, hidden_size, dtype=jnp.float32):
    """Mirror reset_parameters(): uniform(-1/sqrt(H), 1/sqrt(H)), PyTorch layout."""
    std = 1.0 / math.sqrt(hidden_size)
    k1, k2, k3, k4 = jax.random.split(key, 4)
    w_x2h = jax.random.uniform(k1, (4 * hidden_size, input_size), dtype, -std, std)
    b_x2h = jax.random.uniform(k2, (4 * hidden_size,), dtype, -std, std)
    w_h2h = jax.random.uniform(k3, (4 * hidden_size, hidden_size), dtype, -std, std)
    b_h2h = jax.random.uniform(k4, (4 * hidden_size,), dtype, -std, std)
    return w_x2h, b_x2h, w_h2h, b_h2h


def lstm_cell_ref(x, hx, cx, w_x2h, b_x2h, w_h2h, b_h2h):
    """Pure-JAX reference mirroring the PyTorch module's forward."""
    gates = x @ w_x2h.T + b_x2h + hx @ w_h2h.T + b_h2h
    H = hx.shape[-1]
    ft, it, ct, ot = (gates[:, i * H:(i + 1) * H] for i in range(4))
    ft, it, ot = jax.nn.sigmoid(ft), jax.nn.sigmoid(it), jax.nn.sigmoid(ot)
    ct = jnp.tanh(ct)
    cy = ft * cx + it * ct
    hy = ot * jnp.tanh(cy)
    return hy, cy


if __name__ == "__main__":
    key = jax.random.PRNGKey(0)

    # --- test 1: small shapes, f32 end-to-end, tight tolerance -------------
    B, INPUT, HIDDEN = 8, 16, 32
    kp, kx, kh, kc, key = jax.random.split(key, 5)
    params = make_params(kp, INPUT, HIDDEN)
    x = jax.random.normal(kx, (B, INPUT), jnp.float32)
    hx = jax.random.normal(kh, (B, HIDDEN), jnp.float32)
    cx = jax.random.normal(kc, (B, HIDDEN), jnp.float32)

    hy, cy = lstm_cell(x, hx, cx, *params)
    jax.block_until_ready((hy, cy))
    hy_ref, cy_ref = lstm_cell_ref(x, hx, cx, *params)
    assert jnp.allclose(hy, hy_ref, atol=1e-5, rtol=1e-5), "hy mismatch (f32)"
    assert jnp.allclose(cy, cy_ref, atol=1e-5, rtol=1e-5), "cy mismatch (f32)"

    # --- test 2: multi-tile grid (2 hidden tiles, 3 K steps), bf16 compute --
    B2, INPUT2, HIDDEN2 = 16, 128, 256
    kp, kx, kh, kc, key = jax.random.split(key, 5)
    params2 = make_params(kp, INPUT2, HIDDEN2)
    x2 = jax.random.normal(kx, (B2, INPUT2), jnp.float32)
    hx2 = jax.random.normal(kh, (B2, HIDDEN2), jnp.float32)
    cx2 = jax.random.normal(kc, (B2, HIDDEN2), jnp.float32)

    hy2, cy2 = lstm_cell(x2, hx2, cx2, *params2,
                         compute_dtype=jnp.bfloat16, th_max=128, tk_max=128)
    jax.block_until_ready((hy2, cy2))
    hy2_ref, cy2_ref = lstm_cell_ref(x2, hx2, cx2, *params2)
    assert jnp.allclose(hy2, hy2_ref, atol=3e-2, rtol=3e-2), "hy mismatch (bf16)"
    assert jnp.allclose(cy2, cy2_ref, atol=3e-2, rtol=3e-2), "cy mismatch (bf16)"

    print("KERNEL_OK")
</pallas_src>

<mosaic_0001>
module attributes {stable_mosaic.version = 11 : i64} {
  func.func @lstm_cell_kernel(%arg0: i32, %arg1: i32, %arg2: i32, %arg3: memref<8x48xf32, #tpu.memory_space<vmem>>, %arg4: memref<48x128xf32, #tpu.memory_space<vmem>>, %arg5: memref<1x128xf32, #tpu.memory_space<vmem>>, %arg6: memref<8x32xf32, #tpu.memory_space<vmem>>, %arg7: memref<8x32xf32, #tpu.memory_space<vmem>>, %arg8: memref<8x32xf32, #tpu.memory_space<vmem>>, %arg9: memref<8x128xf32, #tpu.memory_space<vmem>>) attributes {dimension_semantics = [#tpu.dimension_semantics<parallel>, #tpu.dimension_semantics<parallel>, #tpu.dimension_semantics<arbitrary>], iteration_bounds = array<i64: 1, 1, 1>, scalar_prefetch = 0 : i64, scratch_operands = 1 : i64, tpu.core_type = #tpu.core_type<tc>, window_params = [{transform_indices = @transform_0, window_bounds = array<i64: 8, 48>}, {transform_indices = @transform_1, window_bounds = array<i64: 48, 128>}, {transform_indices = @transform_2, window_bounds = array<i64: 1, 128>}, {transform_indices = @transform_3, window_bounds = array<i64: 8, 32>}, {transform_indices = @transform_4, window_bounds = array<i64: 8, 32>}, {transform_indices = @transform_5, window_bounds = array<i64: 8, 32>}]} {
    %c0_i32 = arith.constant 0 : i32
    %0 = arith.cmpi eq, %arg2, %c0_i32 : i32
    %1 = arith.extui %0 : i1 to i32
    %c0_i32_0 = arith.constant 0 : i32
    %2 = arith.cmpi ne, %1, %c0_i32_0 : i32
    scf.if %2 {
      %c0_10 = arith.constant 0 : index
      %c0_11 = arith.constant 0 : index
      %12 = vector.load %arg5[%c0_10, %c0_11] : memref<1x128xf32, #tpu.memory_space<vmem>>, vector<1x128xf32>
      %13 = vector.shape_cast %12 : vector<1x128xf32> to vector<1x128xf32>
      %14 = vector.broadcast %13 : vector<1x128xf32> to vector<8x128xf32>
      %c0_12 = arith.constant 0 : index
      %c0_13 = arith.constant 0 : index
      %15 = vector.load %arg9[%c0_12, %c0_13] : memref<8x128xf32, #tpu.memory_space<vmem>>, vector<8x128xf32>
      tpu.vector_store %arg9[%c0_12, %c0_13], %14 {strides = array<i32>} : memref<8x128xf32, #tpu.memory_space<vmem>>, vector<8x128xf32>,
    } else {
    }
    %c0 = arith.constant 0 : index
    %c0_1 = arith.constant 0 : index
    %3 = vector.load %arg9[%c0, %c0_1] : memref<8x128xf32, #tpu.memory_space<vmem>>, vector<8x128xf32>
    %c0_2 = arith.constant 0 : index
    %c0_3 = arith.constant 0 : index
    %4 = vector.load %arg3[%c0_2, %c0_3] : memref<8x48xf32, #tpu.memory_space<vmem>>, vector<8x48xf32>
    %c0_4 = arith.constant 0 : index
    %c0_5 = arith.constant 0 : index
    %5 = vector.load %arg4[%c0_4, %c0_5] : memref<48x128xf32, #tpu.memory_space<vmem>>, vector<48x128xf32>
    %cst = arith.constant dense<0.000000e+00> : vector<8x128xf32>
    %6 = tpu.matmul %4, %5, %cst {dimension_numbers = #tpu.dot_dimension_numbers<[1], [0], [0], [1], [0, 0, 1, 1], [], []>} : vector<8x48xf32>, vector<48x128xf32>, vector<8x128xf32> -> vector<8x128xf32>
    %7 = arith.addf %3, %6 : vector<8x128xf32>
    %c0_6 = arith.constant 0 : index
    %c0_7 = arith.constant 0 : index
    %8 = vector.load %arg9[%c0_6, %c0_7] : memref<8x128xf32, #tpu.memory_space<vmem>>, vector<8x128xf32>
    tpu.vector_store %arg9[%c0_6, %c0_7], %7 {strides = array<i32>} : memref<8x128xf32, #tpu.memory_space<vmem>>, vector<8x128xf32>,
    %c0_i32_8 = arith.constant 0 : i32
    %9 = arith.cmpi eq, %arg2, %c0_i32_8 : i32
    %10 = arith.extui %9 : i1 to i32
    %c0_i32_9 = arith.constant 0 : i32
    %11 = arith.cmpi ne, %10, %c0_i32_9 : i32
    scf.if %11 {
      %c0_10 = arith.constant 0 : index
      %c0_11 = arith.constant 0 : index
      %12 = vector.load %arg9[%c0_10, %c0_11] : memref<8x128xf32, #tpu.memory_space<vmem>>, vector<8x32xf32>
      %cst_12 = arith.constant 5.000000e-01 : f32
      %13 = vector.broadcast %cst_12 : f32 to vector<8x32xf32>
      %14 = arith.mulf %13, %12 : vector<8x32xf32>
      %15 = math.tanh %14 : vector<8x32xf32>
      %cst_13 = arith.constant 1.000000e+00 : f32
      %16 = vector.broadcast %cst_13 : f32 to vector<8x32xf32>
      %17 = arith.addf %15, %16 : vector<8x32xf32>
      %cst_14 = arith.constant 5.000000e-01 : f32
      %18 = vector.broadcast %cst_14 : f32 to vector<8x32xf32>
      %19 = arith.mulf %18, %17 : vector<8x32xf32>
      %c0_15 = arith.constant 0 : index
      %c32 = arith.constant 32 : index
      %20 = vector.load %arg9[%c0_15, %c32] : memref<8x128xf32, #tpu.memory_space<vmem>>, vector<8x32xf32>
      %cst_16 = arith.constant 5.000000e-01 : f32
      %21 = vector.broadcast %cst_16 : f32 to vector<8x32xf32>
      %22 = arith.mulf %21, %20 : vector<8x32xf32>
      %23 = math.tanh %22 : vector<8x32xf32>
      %cst_17 = arith.constant 1.000000e+00 : f32
      %24 = vector.broadcast %cst_17 : f32 to vector<8x32xf32>
      %25 = arith.addf %23, %24 : vector<8x32xf32>
      %cst_18 = arith.constant 5.000000e-01 : f32
      %26 = vector.broadcast %cst_18 : f32 to vector<8x32xf32>
      %27 = arith.mulf %26, %25 : vector<8x32xf32>
      %c0_19 = arith.constant 0 : index
      %c64 = arith.constant 64 : index
      %28 = vector.load %arg9[%c0_19, %c64] : memref<8x128xf32, #tpu.memory_space<vmem>>, vector<8x32xf32>
      %29 = math.tanh %28 : vector<8x32xf32>
      %c0_20 = arith.constant 0 : index
      %c0_21 = arith.constant 0 : index
      %30 = vector.load %arg6[%c0_20, %c0_21] : memref<8x32xf32, #tpu.memory_space<vmem>>, vector<8x32xf32>
      %31 = arith.mulf %19, %30 : vector<8x32xf32>
      %32 = arith.mulf %27, %29 : vector<8x32xf32>
      %33 = arith.addf %31, %32 : vector<8x32xf32>
      %c0_22 = arith.constant 0 : index
      %c0_23 = arith.constant 0 : index
      %34 = vector.load %arg8[%c0_22, %c0_23] : memref<8x32xf32, #tpu.memory_space<vmem>>, vector<8x32xf32>
      tpu.vector_store %arg8[%c0_22, %c0_23], %33 {strides = array<i32>} : memref<8x32xf32, #tpu.memory_space<vmem>>, vector<8x32xf32>,
      %c0_24 = arith.constant 0 : index
      %c96 = arith.constant 96 : index
      %35 = vector.load %arg9[%c0_24, %c96] : memref<8x128xf32, #tpu.memory_space<vmem>>, vector<8x32xf32>
      %cst_25 = arith.constant 5.000000e-01 : f32
      %36 = vector.broadcast %cst_25 : f32 to vector<8x32xf32>
      %37 = arith.mulf %36, %35 : vector<8x32xf32>
      %38 = math.tanh %37 : vector<8x32xf32>
      %cst_26 = arith.constant 1.000000e+00 : f32
      %39 = vector.broadcast %cst_26 : f32 to vector<8x32xf32>
      %40 = arith.addf %38, %39 : vector<8x32xf32>
      %cst_27 = arith.constant 5.000000e-01 : f32
      %41 = vector.broadcast %cst_27 : f32 to vector<8x32xf32>
      %42 = arith.mulf %41, %40 : vector<8x32xf32>
      %43 = math.tanh %33 : vector<8x32xf32>
      %44 = arith.mulf %42, %43 : vector<8x32xf32>
      %c0_28 = arith.constant 0 : index
      %c0_29 = arith.constant 0 : index
      %45 = vector.load %arg7[%c0_28, %c0_29] : memref<8x32xf32, #tpu.memory_space<vmem>>, vector<8x32xf32>
      tpu.vector_store %arg7[%c0_28, %c0_29], %44 {strides = array<i32>} : memref<8x32xf32, #tpu.memory_space<vmem>>, vector<8x32xf32>,
    } else {
    }
    return
  }
  func.func @transform_0(%arg0: i32, %arg1: i32, %arg2: i32) -> (i32, i32) {
    %c0_i32 = arith.constant 0 : i32
    return %arg0, %arg2 : i32, i32
  }
  func.func @transform_1(%arg0: i32, %arg1: i32, %arg2: i32) -> (i32, i32) {
    %c0_i32 = arith.constant 0 : i32
    return %arg2, %arg1 : i32, i32
  }
  func.func @transform_2(%arg0: i32, %arg1: i32, %arg2: i32) -> (i32, i32) {
    %c0_i32 = arith.constant 0 : i32
    %c0_i32_0 = arith.constant 0 : i32
    return %c0_i32, %arg1 : i32, i32
  }
  func.func @transform_3(%arg0: i32, %arg1: i32, %arg2: i32) -> (i32, i32) {
    %c0_i32 = arith.constant 0 : i32
    return %arg0, %arg1 : i32, i32
  }
  func.func @transform_4(%arg0: i32, %arg1: i32, %arg2: i32) -> (i32, i32) {
    %c0_i32 = arith.constant 0 : i32
    return %arg0, %arg1 : i32, i32
  }
  func.func @transform_5(%arg0: i32, %arg1: i32, %arg2: i32) -> (i32, i32) {
    %c0_i32 = arith.constant 0 : i32
    return %arg0, %arg1 : i32, i32
  }
}

</mosaic_0001>

<bundles_post_ra>
// kernel: tpu_custom_call.1
= control target key start
LH: loop header
LB: loop body
LE: loop exit
PB: predicated region body
PF: predicated region fallthrough
CT: control target
= control target key end

     0   :  { %11 = vsyncpa [#allocation4], 0  ;;  %s462_s0 = inlined_call_operand.hbm [shape: f32[8,48], index: 0, kind: input, shape index: {}]   ;;  %s463_s1 = inlined_call_operand.hbm [shape: f32[48,128], index: 1, kind: input, shape index: {}]   ;;  %s464_s2 = inlined_call_operand.vmem [shape: f32[1,128], index: 2, kind: input, shape index: {}]   ;;  %s465_s3 = inlined_call_operand.vmem [shape: f32[8,32], index: 3, kind: input, shape index: {}]   ;;  %s466_s4 = inlined_call_operand.hbm [shape: f32[8,32], index: 4, kind: output, shape index: {0}]   ;;  %s467_s5 = inlined_call_operand.hbm [shape: f32[8,32], index: 5, kind: output, shape index: {1}]  }
   0x1   :  { %12 = vsyncpa [#allocation7], 0 }
   0x2   :  { %13 = vsyncpa [#allocation5], 0 }
   0x3   :  { %14 = vsyncpa [#allocation10], 0  ;;  %s358_s18 = smov [#allocation3]   ;;  %s359_s20 = smov [#allocation6]  }
   0x4   :  { %s21_s19 = sshll.u32 %s358_s18, 4  ;;  %s30_s21 = sshll.u32 %s359_s20, 4  ;;  %s22_s19 = int_to_ptr.vmem [resolvable:$true] %s21_s19  ;;  %s399_s21 = int_to_ptr.vmem [resolvable:$true] %s30_s21 }
   0x5   :  { %s262_s24 = scalar_lea.hbm %s462_s0, 128 }
   0x6   :  { %p263_p0 = scmp.ne.s32.totalorder %s462_s0, %s262_s24  ;;  %p266_p1 = scmp.lt.u32.totalorder %s262_s24, %s462_s0 }
   0x8   :  { %p268_p2 = pnand %p266_p1, %p263_p0 }
   0xa   :  { %271 = shalt.err (!%p268_p2)
}
   0xb   :  { %s272_s29 = scalar_lea.vmem %s22_s19, 128  ;;  %p277_p4 = scmp.lt.s32.totalorder %s22_s19, %s22_s19 }
   0xc   :  { %p273_p3 = scmp.ne.s32.totalorder %s22_s19, %s272_s29  ;;  %p278_p5 = scmp.lt.s32.totalorder %s272_s29, %s272_s29 }
   0xe   :  { %p279_p6 = por %p278_p5, %p277_p4 }
  0x10   :  { %p280_p7 = pnand %p279_p6, %p273_p3 }
  0x12   :  { %283 = shalt.err (!%p280_p7)
}
  0x13   :  { %24 = dma.hbm_to_vmem [thread:$0]  %s462_s0, 128, %s22_s19, [#allocation4]  }
  0x14   :  { %s284_s9 = scalar_lea.hbm %s463_s1, 768 }
  0x15   :  { %p285_p8 = scmp.ne.s32.totalorder %s463_s1, %s284_s9  ;;  %p288_p9 = scmp.lt.u32.totalorder %s284_s9, %s463_s1 }
  0x17   :  { %p290_p10 = pnand %p288_p9, %p285_p8 }
  0x19   :  { %293 = shalt.err (!%p290_p10)
}
  0x1a   :  { %s294_s14 = scalar_lea.vmem %s399_s21, 768  ;;  %p299_p12 = scmp.lt.s32.totalorder %s399_s21, %s399_s21 }
  0x1b   :  { %p295_p11 = scmp.ne.s32.totalorder %s399_s21, %s294_s14  ;;  %p300_p13 = scmp.lt.s32.totalorder %s294_s14, %s294_s14 }
  0x1d   :  { %p301_p0 = por %p300_p13, %p299_p12 }
  0x1f   :  { %p302_p1 = pnand %p301_p0, %p295_p11 }
  0x21   :  { %305 = shalt.err (!%p302_p1)
}
  0x22   :  { %s360_s0 = smov 128   ;;  %s361_s15 = smov 8  }
  0x23   :  { %36 = dma.hbm_to_vmem [thread:$0]  %s463_s1, 768, %s399_s21, [#allocation7], %s360_s0, %s360_s0, %s361_s15  }
  0x24   :  { %350 = dma.done.wait [#allocation4], 128  }
  0x25   :  { %351 = vsyncadd [#allocation4], 4294967168 }
  0x26   :  { %352 = dma.done.wait [#allocation7], 768  }
  0x27   :  { %353 = vsyncadd [#allocation7], 4294966528  ;;  %v362_v0 = vmov 0.0|0.0   ;;  %vm363_vm0 = vmmov 0   ;;  %v364_v1 = vmov 0.0   ;;  %v61_v2 = vld [vmem:[#allocation6] sm:$0xff] }
  0x28   :  { %236 = vmatprep.subr.bf16.mxu0 %v362_v0  ;;  %233 = vmatprep.mubr.msk.f32.mxu0 %vm363_vm0, %v364_v1  ;;  %v62_v3 = vld [vmem:[#allocation6 + $0x8] sm:$0xff]  ;;  %v63_v4 = vld [vmem:[#allocation6 + $0x10] sm:$0xff]  ;;  %v64_v6 = vld [vmem:[#allocation6 + $0x18] sm:$0xff]  ;;  %vm67_vm1 = vcmask 392192   ;;  %s365_s19 = smov 96   ;;  %vm164_vm2 = vcmask 261120  }
  0x29   :  { %v237_v5 = vpack.c.bf16 %v62_v3, %v61_v2  ;;  %v240_v7 = vpack.c.bf16 %v64_v6, %v63_v4  ;;  %v65_v8 = vld [vmem:[#allocation6 + $0x20] sm:$0xff]  ;;  %v66_v9 = vld [vmem:[#allocation6 + $0x28] sm:$0xff]  ;;  %v60_v11 = vld [vmem:[#allocation3] sm:$0xff] }
  0x2a   :  { %v243_v10 = vpack.c.bf16 %v66_v9, %v65_v8  ;;  %v212_v12 = vld [vmem:[%s464_s2] ss:$0 sm:$0xff]  ;;  %s366_s2 = smov [#allocation9]  }
  0x2b   :  { %238 = vmatpush3.bf16.msra.mxu0 %v237_v5  ;;  %v152_v23 = vld [vmem:[%s465_s3] sm:$0xff]  ;;  %s198_s22 = sshll.u32 %s366_s2, 4  ;;  %s199_s22 = int_to_ptr.vmem [resolvable:$true] %s198_s22 }
  0x2c   :  { %239 = vmatprep.subr.bf16.mxu0 %v362_v0  ;;  %s306_s23 = scalar_lea.vmem %s199_s22, 128  ;;  %p311_p3 = scmp.lt.s32.totalorder %s199_s22, %s199_s22 }
  0x2d   :  { %p307_p2 = scmp.ne.s32.totalorder %s199_s22, %s306_s23  ;;  %p312_p4 = scmp.lt.s32.totalorder %s306_s23, %s306_s23 }
  0x2f   :  { %241 = vmatpush3.bf16.msra.mxu0 %v240_v7  ;;  %p313_p5 = por %p312_p4, %p311_p3 }
  0x30   :  { %242 = vmatprep.subr.bf16.mxu0 %v362_v0 }
  0x31   :  { %p314_p6 = pnand %p313_p5, %p307_p2 }
  0x33   :  { %244 = vmatpush3.bf16.msra.mxu0 %v243_v10 }
  0x36   :  { %234 = vmatmul.mubr.msk.f32.vlgmr.msra.gmra.mrb[0].mxu0 %vm67_vm1, %v60_v11 }
 0x109   :  { %v137_v13 = vpop.f32.mrb[0].mxu0 }
 0x10a   :  { %v141_v14 = vadd.f32 %v212_v12, %v137_v13  ;;  %v235_v15 = vpop.f32.mrb[1].mxu0 }
 0x10c   :  { %256 = vtanh.f32 %v141_v14  ;;  %v147_v17 = vmul.f32 0.5, %v141_v14 }
 0x10e   :  { %258 = vtanh.f32 %v147_v17 }
 0x116   :  { %v257_v16 = vpop.eup %256 }
 0x117   :  { %155 = vrot.lane.b32.xlu0 %v257_v16, %s365_s19 }
 0x118   :  { %v259_v18 = vpop.eup %258 }
 0x119   :  { %v149_v19 = vadd.f32 1.0, %v259_v18 }
 0x11b   :  { %v150_v20 = vmul.f32 0.5, %v149_v19 }
 0x11d   :  { %v153_v24 = vmul.f32 %v152_v23, %v150_v20 }
 0x189   :  { %v156_v21 = vpop.permute.xlu0 %155 }
 0x18a   :  { %v158_v22 = vmul.f32 %v156_v21, %v150_v20 }
 0x18c   :  { %160 = vrot.lane.b32.xlu0 %v158_v22, %s365_s19 }
 0x1fe   :  { %v161_v25 = vpop.permute.xlu0 %160 }
 0x1ff   :  { %v163_v26 = vadd.f32 %v161_v25, %v153_v24 }
 0x201   :  { %260 = vtanh.f32 %v163_v26  ;;  %165 = vst.msk [vmem:[#allocation9] sm:$0xff] %vm164_vm2, %v163_v26 }
 0x20b   :  { %v261_v27 = vpop.eup %260 }
 0x20c   :  { %173 = vrot.lane.b32.xlu1 %v261_v27, %s365_s19 }
 0x20d   :  { %317 = shalt.err (!%p314_p6)
}
 0x20e   :  { %s318_s25 = scalar_lea.hbm %s467_s5, 128 }
 0x20f   :  { %p319_p7 = scmp.ne.s32.totalorder %s467_s5, %s318_s25  ;;  %p322_p8 = scmp.lt.u32.totalorder %s318_s25, %s467_s5 }
 0x211   :  { %p324_p9 = pnand %p322_p8, %p319_p7 }
 0x213   :  { %327 = shalt.err (!%p324_p9)
}
 0x214   :  { %201 = dma.vmem_to_hbm [thread:$0]  %s199_s22, 128, %s467_s5, [#allocation10]  }
 0x215   :  { %s367_s7 = smov 32   ;;  %s368_s8 = smov [#allocation8]  }
 0x216   :  { %s188_s9 = sshll.u32 %s368_s8, 4  ;;  %s189_s9 = int_to_ptr.vmem [resolvable:$true] %s188_s9 }
 0x217   :  { %s328_s10 = scalar_lea.vmem %s189_s9, 128  ;;  %p333_p11 = scmp.lt.s32.totalorder %s189_s9, %s189_s9 }
 0x218   :  { %p329_p10 = scmp.ne.s32.totalorder %s189_s9, %s328_s10  ;;  %p334_p12 = scmp.lt.s32.totalorder %s328_s10, %s328_s10 }
 0x21a   :  { %p335_p13 = por %p334_p12, %p333_p11 }
 0x21c   :  { %p336_p0 = pnand %p335_p13, %p329_p10 }
 0x27e   :  { %v174_v28 = vpop.permute.xlu1 %173 }
 0x27f   :  { %v176_v29 = vmul.f32 %v174_v28, %v150_v20 }
 0x281   :  { %178 = vrot.lane.b32.xlu1 %v176_v29, %s367_s7 }
 0x2f3   :  { %v179_v30 = vpop.permute.xlu1 %178 }
 0x2f4   :  { %181 = vst.msk [vmem:[#allocation8] sm:$0xff] %vm164_vm2, %v179_v30 }
 0x2f5   :  { %339 = shalt.err (!%p336_p0)
}
 0x2f6   :  { %s340_s5 = scalar_lea.hbm %s466_s4, 128 }
 0x2f7   :  { %p341_p1 = scmp.ne.s32.totalorder %s466_s4, %s340_s5  ;;  %p344_p2 = scmp.lt.u32.totalorder %s340_s5, %s466_s4 }
 0x2f9   :  { %p346_p3 = pnand %p344_p2, %p341_p1 }
 0x2fb   :  { %349 = shalt.err (!%p346_p3)
}
 0x2fc   :  { %191 = dma.vmem_to_hbm [thread:$0]  %s189_s9, 128, %s466_s4, [#allocation5]  }
 0x2fd   :  { %354 = dma.done.wait [#allocation5], 128  }
 0x2fe   :  { %355 = vsyncadd [#allocation5], 4294967168 }
 0x2ff   :  { %356 = dma.done.wait [#allocation10], 128  }
 0x300   :  { %357 = vsyncadd [#allocation10], 4294967168 }
 0x301   :  { %208 = vsyncpa [#allocation4], 1 }
 0x302   :  { %209 = vsyncpa [#allocation7], 1 }
 0x303   :  { %210 = vsyncpa [#allocation5], 1 }
 0x304   :  { %211 = vsyncpa [#allocation10], 1 }

</bundles_post_ra>
